<compile_context>
chip_gen: v7x
topology: tpu7x:2x2x1
jax: 0.10.0
libtpu: 0.0.40
codegen_flags: <defaults>
</compile_context>

<pallas_src>
import functools

import jax
import jax.numpy as jnp
from jax.experimental import pallas as pl
from jax.experimental.pallas import tpu as pltpu

_LANES = 128


def _focal_loss_kernel(alpha_ref, logits_ref, tgt_ref, out_ref, *,
                       gamma, gamma_int, tile_m):
    # alpha_ref : (C, 1)      f32 per-class weights
    # logits_ref: (C, tile_m) logits slab (native layout, class axis = sublanes)
    # tgt_ref   : (1, tile_m) int32 targets (padded columns carry -1)
    # out_ref   : (1, 128)    f32 lane-wise partial sums for this block
    x = logits_ref[...].astype(jnp.float32)            # cast AFTER load (bf16 ok)
    tgt = tgt_ref[...]                                  # (1, tm) int32
    alpha = alpha_ref[...]                               # (C, 1)  f32
    C = x.shape[0]

    # Softmax statistics over the class (sublane) axis.  This exp is the only
    # (C x tile_m) transcendental in the kernel.
    m = jnp.max(x, axis=0, keepdims=True)                # (1, tm)
    e = jnp.exp(x - m)                                   # (C, tm)
    s = jnp.sum(e, axis=0, keepdims=True)                # (1, tm)

    # Gather the target class BEFORE the heavy math (cheap VPU/XLU work).
    cls = jax.lax.broadcasted_iota(jnp.int32, (C, tile_m), 0)
    onehot = (cls == tgt).astype(jnp.float32)            # (C, tm)
    x_t = jnp.sum(onehot * x, axis=0, keepdims=True)      # (1, tm) target logit
    a_t = jnp.sum(onehot * alpha, axis=0, keepdims=True)  # (1, tm) alpha[target]

    # Focal terms evaluated only on the gathered (1, tile_m) row.
    logp_t = (x_t - m) - jnp.log(s)                       # log softmax at target
    p_t = jnp.exp(x_t - m) / s                            # softmax at target
    one_minus = jnp.maximum(1.0 - p_t, 0.0)               # clamp fp rounding
    if gamma_int is not None:
        # Small-integer gamma (e.g. gamma=2): pure VALU multiplies, no EUP pow.
        w = jnp.ones_like(one_minus)
        for _ in range(gamma_int):
            w = w * one_minus
    else:
        # General gamma > 0: exp(gamma*log(.)); log(0) -> -inf -> exp -> 0 is the
        # correct limit of (1-p)^gamma as p -> 1.
        w = jnp.exp(gamma * jnp.log(one_minus))

    loss = -(a_t * w * logp_t)                            # (1, tm) per-position loss
    loss = jnp.where(tgt >= 0, loss, 0.0)                 # mask padded columns

    # Fold tile_m lanes down to one 128-lane partial with static, lane-aligned
    # slices (no relayout, no scalar store).
    partial = loss[:, 0:_LANES]
    for k in range(1, tile_m // _LANES):
        partial = partial + loss[:, k * _LANES:(k + 1) * _LANES]
    out_ref[...] = partial


def _pick_tile(C, HW, requested):
    """Largest lane-dense tile under a ~4 MiB-per-block budget, balanced over HW."""
    hw_ceil = pl.cdiv(HW, _LANES) * _LANES
    if requested is None:
        budget_cols = max(512, (4 * 1024 * 1024) // (max(C, 1) * 4))
        requested = min(8192, budget_cols)
    requested = max(_LANES, (int(requested) // _LANES) * _LANES)
    n_blocks = pl.cdiv(hw_ceil, requested)
    return pl.cdiv(hw_ceil // _LANES, n_blocks) * _LANES


def focal_loss(logits_nchw, target_bhw, alpha, gamma, *, reduction="mean",
               tile_m=None):
    """Pallas TPU implementation of FocalLoss.forward (reduction='mean'/'sum')."""
    B, C, H, W = logits_nchw.shape
    HW = H * W
    M = B * HW

    tile = _pick_tile(C, HW, tile_m)
    hw_pad = pl.cdiv(HW, tile) * tile
    num_tiles = hw_pad // tile

    # Native-layout reshapes only (contiguous, no HBM transpose pass).
    logits = logits_nchw.reshape(B, C, HW)
    tgt = target_bhw.reshape(B, 1, HW).astype(jnp.int32)
    if hw_pad != HW:
        logits = jnp.pad(logits, ((0, 0), (0, 0), (0, hw_pad - HW)))
        tgt = jnp.pad(tgt, ((0, 0), (0, 0), (0, hw_pad - HW)), constant_values=-1)
    alpha_c1 = jnp.asarray(alpha, dtype=jnp.float32).reshape(C, 1)

    g = float(gamma)
    gamma_int = int(g) if (g >= 0.0 and g == int(g) and g <= 8.0) else None

    kernel = functools.partial(_focal_loss_kernel, gamma=g, gamma_int=gamma_int,
                               tile_m=tile)

    partials = pl.pallas_call(
        kernel,
        out_shape=jax.ShapeDtypeStruct((B, num_tiles, 1, _LANES), jnp.float32),
        grid_spec=pltpu.PrefetchScalarGridSpec(
            num_scalar_prefetch=0,
            grid=(B, num_tiles),
            in_specs=[
                pl.BlockSpec((C, 1), lambda b, i: (0, 0)),              # alpha
                pl.BlockSpec((None, C, tile), lambda b, i: (b, 0, i)),  # logits
                pl.BlockSpec((None, 1, tile), lambda b, i: (b, 0, i)),  # target
            ],
            out_specs=pl.BlockSpec((None, None, 1, _LANES),
                                   lambda b, i: (b, i, 0, 0)),
        ),
        compiler_params=pltpu.CompilerParams(
            dimension_semantics=("parallel", "parallel")),
    )(alpha_c1, logits, tgt)

    total = jnp.sum(partials)
    if reduction == "mean":
        return total / M
    elif reduction == "sum":
        return total
    else:
        # TODO(synk): reduction='none' (per-pixel BxHxW output) not implemented.
        raise NotImplementedError(reduction)


def focal_loss_ref(logits, target, alpha, gamma):
    """Pure-JAX reference mirroring the PyTorch forward (reduction='mean')."""
    p = jax.nn.softmax(logits, axis=1)
    logp = jax.nn.log_softmax(logits, axis=1)
    a = alpha.reshape(1, -1, 1, 1).astype(jnp.float32)
    focal = a * (1.0 - p) ** gamma * logp
    picked = jnp.take_along_axis(focal, target[:, None, :, :], axis=1)[:, 0]
    return jnp.mean(-picked)


if __name__ == "__main__":
    key = jax.random.PRNGKey(0)
    B, C, H, W = 2, 4, 16, 16
    k1, k2 = jax.random.split(key)

    x = jax.random.normal(k1, (B, C, H, W), dtype=jnp.float32)
    target = jax.random.randint(k2, (B, H, W), 0, C, dtype=jnp.int32)
    # Deterministic module "parameters": per-class alpha (C,) and scalar gamma.
    alpha = jnp.array([0.25, 0.5, 0.75, 1.0], dtype=jnp.float32)
    gamma = 2.0

    loss = focal_loss(x, target, alpha, gamma, reduction="mean")
    loss = jax.block_until_ready(loss)

    ref = focal_loss_ref(x, target, alpha, gamma)
    assert jnp.allclose(loss, ref, rtol=1e-4, atol=1e-6), (loss, ref)

    print("KERNEL_OK")
</pallas_src>

<mosaic_0001>
module attributes {stable_mosaic.version = 11 : i64} {
  func.func @_focal_loss_kernel(%arg0: i32, %arg1: i32, %arg2: memref<4x1xf32, #tpu.memory_space<vmem>>, %arg3: memref<1x4x256xf32, #tpu.memory_space<vmem>>, %arg4: memref<1x1x256xi32, #tpu.memory_space<vmem>>, %arg5: memref<1x1x1x128xf32, #tpu.memory_space<vmem>>) attributes {dimension_semantics = [#tpu.dimension_semantics<parallel>, #tpu.dimension_semantics<parallel>], iteration_bounds = array<i64: 2, 1>, scalar_prefetch = 0 : i64, scratch_operands = 0 : i64, tpu.core_type = #tpu.core_type<tc>, window_params = [{pipeline_mode = #tpu.pipeline_mode<synchronous>, transform_indices = @transform_0, window_bounds = array<i64: 4, 1>}, {transform_indices = @transform_1, window_bounds = array<i64: 1, 4, 256>}, {transform_indices = @transform_2, window_bounds = array<i64: 1, 1, 256>}, {transform_indices = @transform_3, window_bounds = array<i64: 1, 1, 1, 128>}]} {
    %c0 = arith.constant 0 : index
    %c0_0 = arith.constant 0 : index
    %c0_1 = arith.constant 0 : index
    %0 = vector.load %arg3[%c0, %c0_0, %c0_1] : memref<1x4x256xf32, #tpu.memory_space<vmem>>, vector<1x4x256xf32>
    %1 = vector.shape_cast %0 : vector<1x4x256xf32> to vector<4x256xf32>
    %c0_2 = arith.constant 0 : index
    %c0_3 = arith.constant 0 : index
    %c0_4 = arith.constant 0 : index
    %2 = vector.load %arg4[%c0_2, %c0_3, %c0_4] : memref<1x1x256xi32, #tpu.memory_space<vmem>>, vector<1x1x256xi32>
    %3 = vector.shape_cast %2 : vector<1x1x256xi32> to vector<1x256xi32>
    %c0_5 = arith.constant 0 : index
    %c0_6 = arith.constant 0 : index
    %4 = vector.load %arg2[%c0_5, %c0_6] : memref<4x1xf32, #tpu.memory_space<vmem>>, vector<4x1xf32>
    %cst = arith.constant dense<0xFF800000> : vector<256xf32>
    %5 = vector.multi_reduction <maximumf>, %1, %cst [0] : vector<4x256xf32> to vector<256xf32>
    %6 = vector.shape_cast %5 : vector<256xf32> to vector<1x256xf32>
    %7 = vector.broadcast %6 : vector<1x256xf32> to vector<4x256xf32>
    %8 = arith.subf %1, %7 : vector<4x256xf32>
    %9 = math.exp %8 : vector<4x256xf32>
    %cst_7 = arith.constant dense<0.000000e+00> : vector<256xf32>
    %10 = vector.multi_reduction <add>, %9, %cst_7 [0] : vector<4x256xf32> to vector<256xf32>
    %11 = vector.shape_cast %10 : vector<256xf32> to vector<1x256xf32>
    %12 = tpu.iota {dimensions = array<i32: 0>} : vector<4x256xi32>
    %13 = vector.broadcast %3 : vector<1x256xi32> to vector<4x256xi32>
    %14 = arith.cmpi eq, %12, %13 : vector<4x256xi32>
    %15 = arith.extui %14 : vector<4x256xi1> to vector<4x256xi32>
    %16 = arith.sitofp %15 : vector<4x256xi32> to vector<4x256xf32>
    %17 = arith.mulf %16, %1 : vector<4x256xf32>
    %cst_8 = arith.constant dense<0.000000e+00> : vector<256xf32>
    %18 = vector.multi_reduction <add>, %17, %cst_8 [0] : vector<4x256xf32> to vector<256xf32>
    %19 = vector.shape_cast %18 : vector<256xf32> to vector<1x256xf32>
    %20 = vector.broadcast %4 : vector<4x1xf32> to vector<4x256xf32>
    %21 = arith.mulf %16, %20 : vector<4x256xf32>
    %cst_9 = arith.constant dense<0.000000e+00> : vector<256xf32>
    %22 = vector.multi_reduction <add>, %21, %cst_9 [0] : vector<4x256xf32> to vector<256xf32>
    %23 = vector.shape_cast %22 : vector<256xf32> to vector<1x256xf32>
    %24 = arith.subf %19, %6 : vector<1x256xf32>
    %25 = math.log %11 : vector<1x256xf32>
    %26 = arith.subf %24, %25 : vector<1x256xf32>
    %27 = arith.subf %19, %6 : vector<1x256xf32>
    %28 = math.exp %27 : vector<1x256xf32>
    %29 = arith.divf %28, %11 : vector<1x256xf32>
    %cst_10 = arith.constant 1.000000e+00 : f32
    %30 = vector.broadcast %cst_10 : f32 to vector<1x256xf32>
    %31 = arith.subf %30, %29 : vector<1x256xf32>
    %cst_11 = arith.constant 0.000000e+00 : f32
    %32 = vector.broadcast %cst_11 : f32 to vector<1x256xf32>
    %33 = arith.maximumf %31, %32 : vector<1x256xf32>
    %cst_12 = arith.constant 1.000000e+00 : f32
    %34 = vector.broadcast %cst_12 : f32 to vector<1x256xf32>
    %35 = arith.mulf %34, %33 : vector<1x256xf32>
    %36 = arith.mulf %35, %33 : vector<1x256xf32>
    %37 = arith.mulf %23, %36 : vector<1x256xf32>
    %38 = arith.mulf %37, %26 : vector<1x256xf32>
    %cst_13 = arith.constant 0.000000e+00 : f32
    %39 = vector.broadcast %cst_13 : f32 to vector<1x256xf32>
    %40 = arith.subf %39, %38 : vector<1x256xf32>
    %c0_i32 = arith.constant 0 : i32
    %41 = vector.broadcast %c0_i32 : i32 to vector<1x256xi32>
    %42 = arith.cmpi sge, %3, %41 : vector<1x256xi32>
    %cst_14 = arith.constant 0.000000e+00 : f32
    %43 = vector.broadcast %cst_14 : f32 to vector<1x256xf32>
    %44 = arith.select %42, %40, %43 : vector<1x256xi1>, vector<1x256xf32>
    %45 = vector.extract_strided_slice %44 {offsets = [0, 0], sizes = [1, 128], strides = [1, 1]} : vector<1x256xf32> to vector<1x128xf32>
    %46 = vector.extract_strided_slice %44 {offsets = [0, 128], sizes = [1, 128], strides = [1, 1]} : vector<1x256xf32> to vector<1x128xf32>
    %47 = arith.addf %45, %46 : vector<1x128xf32>
    %c0_15 = arith.constant 0 : index
    %c0_16 = arith.constant 0 : index
    %c0_17 = arith.constant 0 : index
    %c0_18 = arith.constant 0 : index
    %48 = vector.load %arg5[%c0_15, %c0_16, %c0_17, %c0_18] : memref<1x1x1x128xf32, #tpu.memory_space<vmem>>, vector<1x1x1x128xf32>
    %49 = vector.shape_cast %48 : vector<1x1x1x128xf32> to vector<1x128xf32>
    %50 = vector.shape_cast %47 : vector<1x128xf32> to vector<1x1x1x128xf32>
    tpu.vector_store %arg5[%c0_15, %c0_16, %c0_17, %c0_18], %50 {strides = array<i32>} : memref<1x1x1x128xf32, #tpu.memory_space<vmem>>, vector<1x1x1x128xf32>,
    return
  }
  func.func @transform_0(%arg0: i32, %arg1: i32) -> (i32, i32) {
    %c0_i32 = arith.constant 0 : i32
    %c0_i32_0 = arith.constant 0 : i32
    %c0_i32_1 = arith.constant 0 : i32
    return %c0_i32, %c0_i32_0 : i32, i32
  }
  func.func @transform_1(%arg0: i32, %arg1: i32) -> (i32, i32, i32) {
    %c0_i32 = arith.constant 0 : i32
    %c0_i32_0 = arith.constant 0 : i32
    return %arg0, %c0_i32, %arg1 : i32, i32, i32
  }
  func.func @transform_2(%arg0: i32, %arg1: i32) -> (i32, i32, i32) {
    %c0_i32 = arith.constant 0 : i32
    %c0_i32_0 = arith.constant 0 : i32
    return %arg0, %c0_i32, %arg1 : i32, i32, i32
  }
  func.func @transform_3(%arg0: i32, %arg1: i32) -> (i32, i32, i32, i32) {
    %c0_i32 = arith.constant 0 : i32
    %c0_i32_0 = arith.constant 0 : i32
    %c0_i32_1 = arith.constant 0 : i32
    return %arg0, %arg1, %c0_i32, %c0_i32_0 : i32, i32, i32, i32
  }
}

</mosaic_0001>

<bundles_post_ra>
// kernel: tpu_custom_call.1
= control target key start
LH: loop header
LB: loop body
LE: loop exit
PB: predicated region body
PF: predicated region fallthrough
CT: control target
= control target key end

     0   :  { %8 = vsyncpa [#allocation3], 0  ;;  %s933_s0 = inlined_call_operand.vmem [shape: f32[4,1], index: 0, kind: input, shape index: {}]   ;;  %s934_s1 = inlined_call_operand.hbm [shape: f32[2,4,256], index: 1, kind: input, shape index: {}]   ;;  %s935_s2 = inlined_call_operand.vmem [shape: s32[2,1,256], index: 2, kind: input, shape index: {}]   ;;  %s936_s3 = inlined_call_operand.hbm [shape: f32[2,1,1,128], index: 3, kind: output, shape index: {}]  }
   0x1   :  { %10 = vsyncpa [#allocation3 + $0x1], 0 }
   0x2   :  { %11 = vsyncpa [#allocation4], 0 }
   0x3   :  { %13 = vsyncpa [#allocation4 + $0x1], 0  ;;  %s732_s12 = smov 0   ;;  %s734_s13 = smov 0  }
   0x4   :  { %s736_s14 = smov 0   ;;  %s738_s15 = smov 0  }
   0x5   :  { %s740_s16 = smov 0   ;;  %s742_s17 = smov 0  }
   0x6 LB: > { %s496_s18 = sadd.s32 4294967295, %s705_s17   ;;  %s497_s19 = sadd.s32 4294967294, %s705_s17   ;;  %s705_s17 = sphi %s742_s17, %s19_s17   ;;  %s701_s16 = sphi %s740_s16, %s952_s16   ;;  %s697_s15 = sphi %s738_s15, %s951_s15   ;;  %s693_s14 = sphi %s736_s14, %s950_s14   ;;  %s689_s13 = sphi %s734_s13, %s949_s13   ;;  %s685_s12 = sphi %s732_s12, %s948_s12  }
   0x7   : > { %s31_s20 = sadd.s32 1, %s701_s16  ;;  %s61_s21 = sadd.s32 1, %s693_s14 }
   0x8   : > { %p33_p0 = scmp.ge.s32.totalorder %s31_s20, 2  ;;  %p68_p1 = scmp.ne.s32.totalorder %s693_s14, %s689_s13 }
   0x9   : > { %p69_p2 = scmp.eq.s32.totalorder %s705_s17, 0  ;;  %p74_p3 = scmp.ne.s32.totalorder %s689_s13, %s685_s12 }
   0xa   : > { %s954_s20 = smov (%p33_p0, %s31_s20), 0  ;;  %p75_p5 = scmp.eq.s32.totalorder %s496_s18, 0 }
   0xb   : > { %p773_p4 = por %p69_p2, %p68_p1  ;;  %s56_s23 = ssub.s32 %s701_s16, %s954_s20 }
   0xc   : > { %p128_p6 = scmp.eq.s32.totalorder %s496_s18, 1  ;;  %p59_p7 = scmp.eq.s32.totalorder %s56_s23, 0 }
   0xd   : > { %p779_p8 = por %p75_p5, %p74_p3  ;;  %p134_p10 = scmp.eq.s32.totalorder %s497_s19, 1 }
   0xe   : > { %p783_p9 = por %p128_p6, %p68_p1  ;;  %p524_p13 = scmp.lt.s32.totalorder %s705_s17, 2 }
   0xf   : > { %s788_s26 = scalar_select %p59_p7, %s693_s14, %s61_s21  }
  0x10   : > { %s940_s25 = scalar_select %p783_p9, 1, 0 }
  0x11   : > { %p790_p11 = por %p134_p10, %p74_p3  ;;  %s157_s28 = sand.u32 1, %s693_s14  }
  0x12   : > { %s500_s29 = sshll.u32 %s157_s28, 3  ;;  %s511_s30 = sshll.u32 %s701_s16, 7 }
  0x13   : > { %s941_s27 = scalar_select %p790_p11, 1, 0 }
  0x14   : > { %s801_s6 = scalar_lea.hbm %s934_s1, %s511_s30  ;;  %s161_s7 = scalar_lea.vmem [#allocation2], %s500_s29 }
  0x15   : > { %s171_s8 = sshll.u32 %s161_s7, 4  ;;  %p807_p0 = pnand %p524_p13, %p773_p4  ;;  %s803_s8 = int_to_ptr.vmem [resolvable:$true] %s171_s8 }
  0x16   : > { %s158_s10 = scalar_lea.sflag [#allocation3], %s157_s28  ;;  %s593_s11 = scalar_lea.hbm %s801_s6, 128 }
  0x17   : > { %p594_p3 = scmp.ne.s32.totalorder %s801_s6, %s593_s11  ;;  %p595_p5 = pneg %p807_p0 }
  0x18   : > { %s598_s21 = scalar_lea.hbm %s934_s1, 256  ;;  %p599_p4 = scmp.lt.u32.totalorder %s801_s6, %s934_s1 }
  0x19   : > { %p596_p6 = pnand %p595_p5, %p594_p3  ;;  %p600_p10 = scmp.lt.u32.totalorder %s598_s21, %s593_s11 }
  0x1a   : > { %p602_p12 = scmp.lt.u32.totalorder %s593_s11, %s801_s6 }
  0x1b   : > { %p597_p7 = pneg %p596_p6  ;;  %p601_p13 = por %p600_p10, %p599_p4 }
  0x1d   : > { %p603_p1 = por %p602_p12, %p601_p13 }
  0x1f   : > { %p604_p2 = pnand %p603_p1, %p597_p7 }
  0x21   : > { %607 = shalt.err (!%p604_p2)
}
  0x22   : > { %s608_s28 = scalar_lea.vmem %s803_s8, 128  ;;  %s707_s29 = smov [#allocation2]  }
  0x23   : > { %p609_p3 = scmp.ne.s32.totalorder %s803_s8, %s608_s28  ;;  %s613_s30 = sshll.u32 %s707_s29, 4  ;;  %s614_s30 = int_to_ptr.vmem [resolvable:$false] %s613_s30 }
  0x24   : > { %s615_s4 = scalar_lea.vmem %s614_s30, 256  ;;  %p616_p9 = scmp.lt.s32.totalorder %s803_s8, %s614_s30 }
  0x25   : > { %p611_p6 = pnand %p609_p3, %p595_p5  ;;  %p617_p4 = scmp.lt.s32.totalorder %s615_s4, %s608_s28 }
  0x27   : > { %p612_p11 = pneg %p611_p6  ;;  %p618_p10 = por %p617_p4, %p616_p9 }
  0x29   : > { %p619_p12 = pnand %p618_p10, %p612_p11 }
  0x2b   : > { %622 = shalt.err (!%p619_p12)
}
  0x2c   : > { %519 = dma.hbm_to_vmem [thread:$0]  (!%p807_p0), %s801_s6, 128, %s803_s8, %s158_s10  }
  0x2d   : > { %p943_p1 = scmp.lt.s32.totalorder %s705_s17, 3  ;;  %p944_p2 = scmp.ge.s32.totalorder %s705_s17, 1 }
  0x2f   : > { %p189_p5 = pnand %p944_p2, %p943_p1 }
  0x30   : > { %s843_s5 = sand.u32 (!%p189_p5), 1, %s689_s13  }
  0x31   : > { %192 = sbr.rel (%p189_p5) target bundleno = 233 (0xe9), region = 32  ;;  %s504_s7 = sshll.u32 (!%p189_p5), %s843_s5, 3 }
  0x32   : > { %s195_s11 = scalar_lea.sflag (!%p189_p5), [#allocation3], %s843_s5  ;;  %s198_s18 = scalar_lea.vmem (!%p189_p5), [#allocation2], %s504_s7 }
  0x38   : > { %676 = dma.done.wait (%p779_p8), %s195_s11, 128  }
  0x39   : > { %678 = vsyncadd (%p779_p8), %s195_s11, 4294967168  ;;  %v708_v0 = vmov 0   ;;  %v240_v1 = vld [vmem:[%s933_s0] sm:$0xf]  ;;  %v238_v2 = vld [vmem:[%s198_s18] sm:$0xff]  ;;  %vm244_vm0 = vcmask 1043456   ;;  %v283_v14 = vlaneseq }
  0x3a   : > { %577 = vset.pattern.permute.xlu0 %v708_v0  ;;  %v242_v3 = vcombine.high %v238_v2, %v238_v2  ;;  %v245_v4 = vsel %vm244_vm0, %v238_v2, -inf  ;;  %p230_p8 = scmp.lt.s32.totalorder %s697_s15, 1  ;;  %v709_v28 = vmov 0.0   ;;  %s508_s22 = sshll.u32 %s697_s15, 4 }
  0x3b   : > { %317 = vperm.xlu0 %577, %v240_v1   ;;  %v246_v6 = vrot.slane %v245_v4, 4  ;;  %v858_v17 = vshrl.u32 %v283_v14, 7  ;;  %s227_s23 = scalar_lea.vmem [#allocation5], %s843_s5  ;;  %s884_s4 = scalar_lea.hbm %s936_s3, %s508_s22 }
  0x3c   : > { %v252_v5 = vsel %vm244_vm0, %v242_v3, -inf  ;;  %s231_s24 = scalar_select %p230_p8, %s697_s15, 1 }
  0x3d   : > { %v253_v7 = vrot.slane %v252_v5, 4  ;;  %v247_v8 = vmax.f32 %v245_v4, %v246_v6  ;;  %v287_v20 = vsub.s32 0, %v858_v17  ;;  %v291_v22 = vsub.s32 1, %v858_v17  ;;  %s403_s28 = sshll.u32 %s227_s23, 4  ;;  %s390_s7 = scalar_lea.sflag [#allocation4], %s843_s5  ;;  %s886_s28 = int_to_ptr.vmem [resolvable:$true] %s403_s28 }
  0x3e   : > { %s505_s9 = sshll.u32 %s231_s24, 1  ;;  %s623_s11 = scalar_lea.vmem %s886_s28, 16 }
  0x3f   : > { %v254_v9 = vmax.f32 %v252_v5, %v253_v7  ;;  %v248_v10 = vrot.slane %v247_v8, 2  ;;  %s236_s21 = scalar_lea.vmem %s935_s2, %s505_s9  ;;  %p624_p9 = scmp.ne.s32.totalorder %s886_s28, %s623_s11 }
  0x40   : > { %v865_v23 = vld [vmem:[%s236_s21] sm:$0x3]  ;;  %p945_p11 = scmp.ne.s32.totalorder %s940_s25, 0  ;;  %s711_s15 = smov [#allocation5]  }
  0x41   : > { %v255_v11 = vrot.slane %v254_v9, 2  ;;  %v249_v12 = vmax.f32 %v247_v8, %v248_v10  ;;  %v288_v25 = vrot.slane %v865_v23, %v287_v20  ;;  %v292_v26 = vrot.slane %v865_v23, %v291_v22  ;;  %s627_s18 = sshll.u32 %s711_s15, 4  ;;  %s628_s18 = int_to_ptr.vmem [resolvable:$false] %s627_s18 }
  0x42   : > { %vm364_vm3 = vcmp.ge.s32.totalorder %v865_v23, 0  ;;  %p625_p0 = pnand %p624_p9, %p945_p11  ;;  %s629_s6 = scalar_lea.vmem %s628_s18, 32 }
  0x43   : > { %v256_v13 = vmax.f32 %v254_v9, %v255_v11  ;;  %v250_v15 = vrot.slane %v249_v12, 1  ;;  %vm293_vm1 = vcmp.eq.s32.totalorder %v858_v17, %v288_v25  ;;  %vm294_vm2 = vcmp.eq.s32.totalorder %v858_v17, %v292_v26  ;;  %p630_p13 = scmp.lt.s32.totalorder %s886_s28, %s628_s18  ;;  %p631_p3 = scmp.lt.s32.totalorder %s629_s6, %s623_s11 }
  0x44   : > { %v506_v29 = vsel %vm293_vm1, 1.0, %v709_v28  ;;  %v507_v30 = vsel %vm294_vm2, 1.0, %v709_v28  ;;  %p626_p7 = pneg %p625_p0 }
  0x45   : > { %v257_v16 = vrot.slane %v256_v13, 1  ;;  %v251_v18 = vmax.f32 %v249_v12, %v250_v15  ;;  %v299_v31 = vmul.f32 %v506_v29, %v238_v2  ;;  %v300_v32 = vmul.f32 %v507_v30, %v242_v3  ;;  %p632_p6 = por %p631_p3, %p630_p13 }
  0x47   : > { %v258_v19 = vmax.f32 %v256_v13, %v257_v16  ;;  %v301_v33 = vsel %vm244_vm0, %v299_v31, 0.0  ;;  %v308_v34 = vsel %vm244_vm0, %v300_v32, 0.0  ;;  %v710_v32 = vmov 1966171168   ;;  %p633_p4 = pnand %p632_p6, %p626_p7 }
  0x48   : > { %v302_v35 = vrot.slane %v301_v33, 4  ;;  %v309_v37 = vrot.slane %v308_v34, 4 }
  0x49   : > { %v261_v21 = vcombine.low %v251_v18, %v258_v19 }
  0x4a   : > { %v303_v39 = vadd.f32 %v302_v35, %v301_v33  ;;  %v310_v40 = vadd.f32 %v309_v37, %v308_v34  ;;  %v369_v33 = vunpack.c.l.s4 %v710_v32 }
  0x4b   : > { %v263_v24 = vsub.f32 %v238_v2, %v261_v21 }
  0x4c   : > { %v304_v43 = vrot.slane %v303_v39, 2  ;;  %v311_v44 = vrot.slane %v310_v40, 2 }
  0x4d   : > { %v264_v27 = vmul.f32 1.442695, %v263_v24 }
  0x4e   : > { %v305_v47 = vadd.f32 %v304_v43, %v303_v39  ;;  %v312_v48 = vadd.f32 %v311_v44, %v310_v40 }
  0x4f   : > { %579 = vpow2.f32 %v264_v27 }
  0x50   : > { %v306_v51 = vrot.slane %v305_v47, 1  ;;  %v313_v52 = vrot.slane %v312_v48, 1 }
  0x52   : > { %v307_v55 = vadd.f32 %v306_v51, %v305_v47  ;;  %v314_v56 = vadd.f32 %v313_v52, %v312_v48 }
  0x54   : > { %v336_v59 = vsub.f32 %v307_v55, %v251_v18  ;;  %v337_v60 = vsub.f32 %v314_v56, %v258_v19 }
  0x56   : > { %v344_v63 = vmul.f32 1.442695, %v336_v59  ;;  %v346_v0 = vmul.f32 1.442695, %v337_v60 }
  0x58   : > { %581 = vpow2.f32 %v344_v63 }
  0x59   : > { %v580_v36 = vpop.eup %579  ;;  %583 = vpow2.f32 %v346_v0 }
  0x5a   : > { %v267_v38 = vcombine.high %v580_v36, %v580_v36  ;;  %v269_v41 = vsel %vm244_vm0, %v580_v36, 0.0 }
  0x5b   : > { %v270_v45 = vrot.slane %v269_v41, 4 }
  0x5c   : > { %v276_v42 = vsel %vm244_vm0, %v267_v38, 0.0 }
  0x5d   : > { %v277_v46 = vrot.slane %v276_v42, 4  ;;  %v271_v49 = vadd.f32 %v270_v45, %v269_v41 }
  0x5f   : > { %v278_v50 = vadd.f32 %v277_v46, %v276_v42  ;;  %v272_v53 = vrot.slane %v271_v49, 2  ;;  %v370_v42 = vunpack.c.0.s8 %v369_v33 }
  0x61   : > { %v279_v54 = vrot.slane %v278_v50, 2  ;;  %v273_v57 = vadd.f32 %v272_v53, %v271_v49  ;;  %v373_v47 = vsub.s32 %v370_v42, %v858_v17 }
  0x62   : > { %v582_v3 = vpop.eup %581 }
  0x63   : > { %v280_v58 = vadd.f32 %v279_v54, %v278_v50  ;;  %v274_v61 = vrot.slane %v273_v57, 1  ;;  %v584_v4 = vpop.eup %583 }
  0x65   : > { %v281_v62 = vrot.slane %v280_v58, 1  ;;  %v275_v1 = vadd.f32 %v274_v61, %v273_v57 }
  0x67   : > { %v282_v2 = vadd.f32 %v281_v62, %v280_v58  ;;  %585 = vrcp.f32 %v275_v1 }
  0x69   : > { %587 = vrcp.f32 %v282_v2 }
  0x6a   : > { %589 = vlog2.f32 %v275_v1 }
  0x6b   : > { %591 = vlog2.f32 %v282_v2 }
  0x71   : > { %v586_v5 = vpop.eup %585 }
  0x72   : > { %v349_v8 = vmul.f32 %v586_v5, %v582_v3 }
  0x73   : > { %v588_v6 = vpop.eup %587 }
  0x74   : > { %v351_v9 = vmul.f32 %v588_v6, %v584_v4  ;;  %v352_v16 = vsub.f32 1.0, %v349_v8  ;;  %v590_v19 = vpop.eup %589 }
  0x75   : > { %v592_v22 = vpop.eup %591 }
  0x76   : > { %v353_v18 = vsub.f32 1.0, %v351_v9  ;;  %v354_v26 = vmax.f32 %v352_v16, 0.0 }
  0x78   : > { %v355_v27 = vmax.f32 %v353_v18, 0.0  ;;  %v356_v36 = vmul.f32 %v354_v26, %v354_v26 }
  0x7a   : > { %v357_v37 = vmul.f32 %v355_v27, %v355_v27 }
  0xba   : > { %v318_v7 = vpop.permute.xlu0 %317 }
  0xbb   : > { %v320_v10 = vmul.f32 %v506_v29, %v318_v7  ;;  %v321_v11 = vmul.f32 %v507_v30, %v318_v7  ;;  %v339_v29 = vmul.f32 0.6931472, %v590_v19  ;;  %v341_v30 = vmul.f32 0.6931472, %v592_v22 }
  0xbd   : > { %v322_v12 = vsel %vm244_vm0, %v320_v10, 0.0  ;;  %v329_v13 = vsel %vm244_vm0, %v321_v11, 0.0  ;;  %v342_v40 = vsub.f32 %v336_v59, %v339_v29  ;;  %v343_v41 = vsub.f32 %v337_v60, %v341_v30 }
  0xbe   : > { %v323_v14 = vrot.slane %v322_v12, 4  ;;  %v330_v15 = vrot.slane %v329_v13, 4 }
  0xc0   : > { %v324_v20 = vadd.f32 %v323_v14, %v322_v12  ;;  %v331_v21 = vadd.f32 %v330_v15, %v329_v13 }
  0xc2   : > { %v325_v24 = vrot.slane %v324_v20, 2  ;;  %v332_v25 = vrot.slane %v331_v21, 2 }
  0xc4   : > { %v326_v28 = vadd.f32 %v325_v24, %v324_v20  ;;  %v333_v31 = vadd.f32 %v332_v25, %v331_v21 }
  0xc6   : > { %v327_v34 = vrot.slane %v326_v28, 1  ;;  %v334_v35 = vrot.slane %v333_v31, 1 }
  0xc8   : > { %v328_v38 = vadd.f32 %v327_v34, %v326_v28  ;;  %v335_v39 = vadd.f32 %v334_v35, %v333_v31 }
  0xca   : > { %v358_v43 = vmul.f32 %v356_v36, %v328_v38  ;;  %v359_v44 = vmul.f32 %v357_v37, %v335_v39 }
  0xcc   : > { %v360_v45 = vmul.f32 %v358_v43, %v342_v40  ;;  %v361_v46 = vmul.f32 %v359_v44, %v343_v41 }
  0xce   : > { %v362_v48 = vsub.f32 0.0, %v360_v45  ;;  %v363_v49 = vsub.f32 0.0, %v361_v46 }
  0xd0   : > { %v367_v50 = vcombine.low %v362_v48, %v363_v49 }
  0xd2   : > { %v374_v51 = vrot.slane %v367_v50, %v373_v47 }
  0xd4   : > { %v381_v52 = vrot.slane %v374_v51, %v373_v47 }
  0xd6   : > { %v383_v53 = vsel %vm364_vm3, %v381_v52, 0.0 }
  0xd7   : > { %v385_v54 = vrot.slane %v383_v53, 1 }
  0xd9   : > { %v387_v55 = vadd.f32 %v385_v54, %v383_v53 }
  0xdb   : > { %388 = vst [vmem:[%s227_s23] sm:$0x1] %v387_v55 }
  0xdc   : > { %636 = shalt.err (!%p633_p4)
}
  0xdd   : > { %s637_s5 = scalar_lea.hbm %s884_s4, 16  ;;  %s641_s9 = scalar_lea.hbm %s936_s3, 32 }
  0xde   : > { %p638_p10 = scmp.ne.s32.totalorder %s884_s4, %s637_s5  ;;  %p642_p2 = scmp.lt.u32.totalorder %s884_s4, %s936_s3 }
  0xdf   : > { %p643_p5 = scmp.lt.u32.totalorder %s641_s9, %s637_s5  ;;  %p645_p9 = scmp.lt.u32.totalorder %s637_s5, %s884_s4 }
  0xe0   : > { %p639_p12 = pnand %p638_p10, %p945_p11 }
  0xe1   : > { %p644_p8 = por %p643_p5, %p642_p2 }
  0xe2   : > { %p640_p1 = pneg %p639_p12 }
  0xe3   : > { %p646_p0 = por %p645_p9, %p644_p8 }
  0xe5   : > { %p647_p7 = pnand %p646_p0, %p640_p1 }
  0xe7   : > { %650 = shalt.err (!%p647_p7)
}
  0xe8   : > { %514 = dma.vmem_to_hbm [thread:$0]  (%p945_p11), %s886_s28, 16, %s884_s4, %s390_s7  }
  0xe9 PF: > { %s415_s21 = sand.u32 1, %s685_s12   ;;  %p946_p13 = scmp.ne.s32.totalorder %s941_s27, 0 }
  0xea   : > { %p947_p3 = scmp.ge.s32.totalorder %s705_s17, 2  ;;  %s416_s22 = scalar_lea.sflag [#allocation4], %s415_s21 }
  0xec   : > { %p521_p6 = pnand %p947_p3, %p946_p13 }
  0xee   : > { %680 = dma.done.wait (!%p521_p6), %s416_s22, 16  }
  0xef   : > { %682 = vsyncadd (!%p521_p6), %s416_s22, 4294967280  ;;  %s19_s17 = sadd.s32 1, %s705_s17   ;;  %s948_s12 = smov %s689_s13 }
  0xf0   : > { %p16_p4 = scmp.ge.s32.totalorder %s19_s17, 4   ;;  %s949_s13 = smov %s693_s14 }
  0xf1   : > { %s950_s14 = smov %s788_s26  ;;  %s951_s15 = smov %s701_s16 }
  0xf2   : > { %s952_s16 = smov %s954_s20  ;;  %18 = sbr.rel (!%p16_p4) target bundleno = 6 (0x6), region = 80 }
  0xf9   :  { %420 = vsyncpa [#allocation3], 1 }
  0xfa   :  { %422 = vsyncpa [#allocation3 + $0x1], 1 }
  0xfb   :  { %423 = vsyncpa [#allocation4], 1 }
  0xfc   :  { %425 = vsyncpa [#allocation4 + $0x1], 1 }

</bundles_post_ra>
